<compile_context>
chip_gen: v7x
topology: tpu7x:2x2x1
jax: 0.10.0
libtpu: 0.0.40
codegen_flags: <defaults>
</compile_context>

<pallas_src>
import jax
import jax.numpy as jnp
from jax import lax
from jax.experimental import pallas as pl
from jax.experimental.pallas import tpu as pltpu


def _round_up(x, m):
    return (x + m - 1) // m * m


def _vmem_capacity_bytes():
    """Detected per-core VMEM capacity (falls back conservatively)."""
    try:
        cap = getattr(pltpu.get_tpu_info(), "vmem_capacity_bytes", None)
        if cap:
            return int(cap)
    except Exception:
        pass
    try:
        if "v7" in jax.devices()[0].device_kind.lower():
            return 64 * 2 ** 20
    except Exception:
        pass
    return 128 * 2 ** 20


def _is_v7x():
    try:
        return "v7" in jax.devices()[0].device_kind.lower()
    except Exception:
        return False


def _vmem_estimate(N, C, C8, TJ, cdt_bytes, attn_bytes):
    """Per-step VMEM footprint (double-buffered blocks + kernel temporaries)."""
    RQ = _round_up(C8, 8)           # sublane padding of the q block
    c8_lanes = _round_up(C8, 128)   # lane padding of the k^T tile
    resident = 2 * (RQ + C) * N * cdt_bytes      # q + v inputs (double-buffered)
    ktile = 2 * TJ * c8_lanes * cdt_bytes        # k^T tiles
    xo = 4 * C * TJ * 4                          # x-in + out blocks (f32, double-buffered)
    attn_out = 2 * TJ * N * attn_bytes           # attention-map tiles
    temps = TJ * N * (3 * 4 + cdt_bytes)         # s_t / e / a (f32) + a cast to MXU dtype
    return resident + ktile + xo + attn_out + temps


def _pick_tile_and_vmem(N, C, C8, cdt_bytes, attn_bytes, tj_hint):
    """Pick a j-tile that divides N, is 128-aligned, and fits the VMEM budget."""
    cap = _vmem_capacity_bytes()
    # ~100 MiB on 128-MiB parts (v5e/v6e); ~78% of capacity (headroom) on v7x.
    budget = 100 * 2 ** 20 if cap >= 120 * 2 ** 20 else int(cap * 0.78)
    cands = [t for t in dict.fromkeys((tj_hint, 512, 256, 128))
             if t is not None and 0 < t <= N and N % t == 0 and t % 128 == 0]
    tj = None
    for t in cands:  # hint first, then 512 -> 256 -> 128
        if _vmem_estimate(N, C, C8, t, cdt_bytes, attn_bytes) <= budget:
            tj = t
            break
    if tj is None:
        # small feature maps (no 128-multiple divides N) use a single j-block;
        # otherwise fall back to the smallest candidate (best effort).
        tj = min(cands) if cands else N
    est = _vmem_estimate(N, C, C8, tj, cdt_bytes, attn_bytes)
    limit = int(min(budget, max(int(est * 1.25), 32 * 2 ** 20)))
    return tj, limit


def _make_kernel(cdt, exp_dtype):
    def kernel(x_ref, q_ref, kT_ref, v_ref, gamma_ref, out_ref, attn_ref):
        # s_t[jl, i] = <k_{j*TJ + jl}, q_i>  -> softmax over i (lane axis),
        # so the attention map is written with NO (N, N) transpose.
        s_t = jnp.dot(kT_ref[0], q_ref[0],
                      preferred_element_type=jnp.float32)           # (TJ, N) f32
        m = jnp.max(s_t, axis=-1, keepdims=True)
        # Exponent optionally in bf16 (v7x EUP); row-sum / normalization stay f32.
        e = jnp.exp((s_t - m).astype(exp_dtype)).astype(jnp.float32)
        denom = jnp.sum(e, axis=-1, keepdims=True)
        # approx reciprocal: rows sum to 1 only to ~2^-12 relative accuracy.
        a = e * pl.reciprocal(denom, approx=True)                    # (TJ, N) f32
        attn_ref[0] = a.astype(attn_ref.dtype)

        # o[c, jl] = sum_i v[c, i] * a[jl, i]
        # NT dot_general (contract both last dims) == jnp.dot(v, a.T): the
        # transposed-RHS MXU form, no explicit (TJ,N) XLU transpose is emitted.
        o = lax.dot_general(v_ref[0], a.astype(cdt),
                            (((1,), (1,)), ((), ())),
                            preferred_element_type=jnp.float32)      # (C, TJ) f32
        out_ref[0] = x_ref[0] + gamma_ref[0] * o

    return kernel


def self_attention_pallas(x_nchw, wq, wk, wv, bq, bk, bv, gamma, *,
                          compute_dtype=jnp.bfloat16,
                          attn_dtype=jnp.float32,
                          exp_dtype=None,
                          tj=None):
    """SAGAN self-attention forward.

    x_nchw : (B, C, H, W) f32
    wq, wk : (C//8, C); wv: (C, C)   (1x1 conv weights, (out, in) layout)
    bq, bk : (C//8,);   bv: (C,)
    gamma  : (1,)
    Returns (out (B, C, H, W) f32, attention_map (B, N, N) attn_dtype) with
    attention_map[b, j, i] = softmax_i(<q_i, k_j>)  (PyTorch softmax(dim=-2), permuted).
    """
    B, C, H, W = x_nchw.shape
    N = H * W
    C8 = wq.shape[0]
    cdt = jnp.dtype(compute_dtype)
    adt = jnp.dtype(attn_dtype)
    if exp_dtype is None:
        # bf16 exponent only pays on v7x (bf16 EUP + fast HBM); keep f32
        # elsewhere and whenever the caller asked for an all-f32 MXU path.
        exp_dtype = (jnp.bfloat16
                     if (_is_v7x() and cdt == jnp.dtype(jnp.bfloat16))
                     else jnp.float32)
    exp_dtype = jnp.dtype(exp_dtype)

    TJ, vmem_limit = _pick_tile_and_vmem(N, C, C8, cdt.itemsize, adt.itemsize, tj)
    NJ = N // TJ

    # NCHW -> (B, C, N): a pure reshape, no wrapper transposes of x.
    x_cn = x_nchw.reshape(B, C, N).astype(jnp.float32)

    # 1x1-conv projections hoisted to XLA (tiny vs. the N^2 attention work);
    # done in f32, then cast once to the MXU input dtype.
    q = (jnp.einsum('oc,bcn->bon', wq, x_cn) + bq[None, :, None]).astype(cdt)    # (B, C8, N)
    kT = (jnp.einsum('oc,bcn->bno', wk, x_cn) + bk[None, None, :]).astype(cdt)   # (B, N, C8)
    v = (jnp.einsum('oc,bcn->bon', wv, x_cn) + bv[None, :, None]).astype(cdt)    # (B, C, N)
    gamma_s = jnp.reshape(gamma, (1,)).astype(jnp.float32)

    kernel = _make_kernel(cdt, exp_dtype)

    out_cn, attn = pl.pallas_call(
        kernel,
        out_shape=(
            jax.ShapeDtypeStruct((B, C, N), jnp.float32),
            jax.ShapeDtypeStruct((B, N, N), adt),
        ),
        grid_spec=pltpu.PrefetchScalarGridSpec(
            num_scalar_prefetch=0,
            grid=(B, NJ),
            in_specs=[
                pl.BlockSpec((1, C, TJ), lambda b, j: (b, 0, j)),    # x residual tile
                pl.BlockSpec((1, C8, N), lambda b, j: (b, 0, 0)),    # q (resident per batch)
                pl.BlockSpec((1, TJ, C8), lambda b, j: (b, j, 0)),   # k^T tile
                pl.BlockSpec((1, C, N), lambda b, j: (b, 0, 0)),     # v (resident per batch)
                pl.BlockSpec(memory_space=pltpu.MemorySpace.SMEM),   # gamma (scalar)
            ],
            out_specs=[
                pl.BlockSpec((1, C, TJ), lambda b, j: (b, 0, j)),    # out (B, C, N), lane-dense
                pl.BlockSpec((1, TJ, N), lambda b, j: (b, j, 0)),    # attention_map (B, N, N)
            ],
        ),
        compiler_params=pltpu.CompilerParams(
            # No cross-iteration state anymore: both axes can be parallel
            # (v7x megacore shares the j-blocks across its two TensorCores).
            dimension_semantics=("parallel", "parallel"),
            vmem_limit_bytes=vmem_limit,
        ),
    )(x_cn, q, kT, v, gamma_s)

    # (B, C, N) -> (B, C, H, W): pure reshape, no transpose, no extra HBM pass.
    return out_cn.reshape(B, C, H, W), attn


def self_attention_reference(x_nchw, wq, wk, wv, bq, bk, bv, gamma):
    """Plain-JAX reference reproducing the PyTorch forward exactly."""
    B, C, H, W = x_nchw.shape
    N = H * W
    xf = x_nchw.reshape(B, C, N)
    q = jnp.einsum('oc,bcn->bno', wq, xf) + bq[None, None, :]    # (B, N, C8)
    k = jnp.einsum('oc,bcn->bon', wk, xf) + bk[None, :, None]    # (B, C8, N)
    v = jnp.einsum('oc,bcn->bon', wv, xf) + bv[None, :, None]    # (B, C, N)
    s = jnp.einsum('bio,boj->bij', q, k)                         # S[b, i, j]
    a_t = jax.nn.softmax(s, axis=1)                              # softmax over dim=-2
    attn_map = jnp.transpose(a_t, (0, 2, 1))                     # (B, N, N)  [j, i]
    o = jnp.einsum('bci,bij->bcj', v, a_t)                       # (B, C, N)
    out = x_nchw + gamma[0] * o.reshape(B, C, H, W)
    return out, attn_map


if __name__ == "__main__":
    B, C, H, W = 2, 16, 8, 8          # in_dim = 16 -> C8 = 2, N = 64
    C8 = C // 8

    key = jax.random.PRNGKey(0)
    ks = jax.random.split(key, 8)
    x = jax.random.normal(ks[0], (B, C, H, W), dtype=jnp.float32)
    wq = 0.1 * jax.random.normal(ks[1], (C8, C), dtype=jnp.float32)
    wk = 0.1 * jax.random.normal(ks[2], (C8, C), dtype=jnp.float32)
    wv = 0.1 * jax.random.normal(ks[3], (C, C), dtype=jnp.float32)
    bq = 0.1 * jax.random.normal(ks[4], (C8,), dtype=jnp.float32)
    bk = 0.1 * jax.random.normal(ks[5], (C8,), dtype=jnp.float32)
    bv = 0.1 * jax.random.normal(ks[6], (C,), dtype=jnp.float32)
    # The module initializes gamma to zero; use a nonzero value here so the
    # residual path is actually exercised by the numerical check.
    gamma = jnp.array([0.7], dtype=jnp.float32)

    out_ref, attn_ref = self_attention_reference(x, wq, wk, wv, bq, bk, bv, gamma)

    # Default path: bf16 MXU inputs on all chips (f32 softmax / accumulation),
    # bf16 exponent only if a v7x is detected.
    out16, attn16 = self_attention_pallas(x, wq, wk, wv, bq, bk, bv, gamma)
    out16, attn16 = jax.block_until_ready((out16, attn16))
    assert out16.shape == (B, C, H, W)
    assert attn16.shape == (B, H * W, H * W)
    assert jnp.allclose(out16, out_ref, atol=3e-2, rtol=3e-2)
    assert jnp.allclose(attn16.astype(jnp.float32), attn_ref, atol=3e-2, rtol=3e-2)

    # All-f32 MXU parity check.
    out32, attn32 = self_attention_pallas(x, wq, wk, wv, bq, bk, bv, gamma,
                                          compute_dtype=jnp.float32,
                                          exp_dtype=jnp.float32)
    out32, attn32 = jax.block_until_ready((out32, attn32))
    assert jnp.allclose(out32, out_ref, atol=5e-3, rtol=5e-3)
    assert jnp.allclose(attn32, attn_ref, atol=5e-3, rtol=5e-3)

    # Optional bf16 attention map (halves the dominant (B, N, N) HBM writeback).
    out_a16, attn_a16 = self_attention_pallas(x, wq, wk, wv, bq, bk, bv, gamma,
                                              attn_dtype=jnp.bfloat16)
    out_a16, attn_a16 = jax.block_until_ready((out_a16, attn_a16))
    assert attn_a16.dtype == jnp.bfloat16
    assert jnp.allclose(out_a16, out_ref, atol=3e-2, rtol=3e-2)
    assert jnp.allclose(attn_a16.astype(jnp.float32), attn_ref, atol=3e-2, rtol=3e-2)

    print("KERNEL_OK")
</pallas_src>

<mosaic_0001>
module attributes {stable_mosaic.version = 11 : i64} {
  func.func @kernel(%arg0: i32, %arg1: i32, %arg2: memref<1x16x64xf32, #tpu.memory_space<vmem>>, %arg3: memref<1x2x64xbf16, #tpu.memory_space<vmem>>, %arg4: memref<1x64x2xbf16, #tpu.memory_space<vmem>>, %arg5: memref<1x16x64xbf16, #tpu.memory_space<vmem>>, %arg6: memref<1xf32, #tpu.memory_space<smem>>, %arg7: memref<1x16x64xf32, #tpu.memory_space<vmem>>, %arg8: memref<1x64x64xf32, #tpu.memory_space<vmem>>) attributes {dimension_semantics = [#tpu.dimension_semantics<parallel>, #tpu.dimension_semantics<parallel>], iteration_bounds = array<i64: 2, 1>, scalar_prefetch = 0 : i64, scratch_operands = 0 : i64, tpu.core_type = #tpu.core_type<tc>, window_params = [{transform_indices = @transform_0, window_bounds = array<i64: 1, 16, 64>}, {transform_indices = @transform_1, window_bounds = array<i64: 1, 2, 64>}, {transform_indices = @transform_2, window_bounds = array<i64: 1, 64, 2>}, {transform_indices = @transform_3, window_bounds = array<i64: 1, 16, 64>}, {transform_indices = @transform_4, window_bounds = array<i64: 1>}, {transform_indices = @transform_5, window_bounds = array<i64: 1, 16, 64>}, {transform_indices = @transform_6, window_bounds = array<i64: 1, 64, 64>}]} {
    %c0 = arith.constant 0 : index
    %c0_0 = arith.constant 0 : index
    %c0_1 = arith.constant 0 : index
    %0 = vector.load %arg4[%c0, %c0_0, %c0_1] : memref<1x64x2xbf16, #tpu.memory_space<vmem>>, vector<1x64x2xbf16>
    %1 = vector.shape_cast %0 : vector<1x64x2xbf16> to vector<64x2xbf16>
    %c0_2 = arith.constant 0 : index
    %c0_3 = arith.constant 0 : index
    %c0_4 = arith.constant 0 : index
    %2 = vector.load %arg3[%c0_2, %c0_3, %c0_4] : memref<1x2x64xbf16, #tpu.memory_space<vmem>>, vector<1x2x64xbf16>
    %3 = vector.shape_cast %2 : vector<1x2x64xbf16> to vector<2x64xbf16>
    %cst = arith.constant dense<0.000000e+00> : vector<64x64xf32>
    %4 = tpu.matmul %1, %3, %cst {dimension_numbers = #tpu.dot_dimension_numbers<[1], [0], [0], [1], [0, 0, 1, 1], [], []>} : vector<64x2xbf16>, vector<2x64xbf16>, vector<64x64xf32> -> vector<64x64xf32>
    %cst_5 = arith.constant dense<0xFF800000> : vector<64xf32>
    %5 = vector.multi_reduction <maximumf>, %4, %cst_5 [1] : vector<64x64xf32> to vector<64xf32>
    %6 = vector.shape_cast %5 : vector<64xf32> to vector<64x1xf32>
    %7 = vector.broadcast %6 : vector<64x1xf32> to vector<64x64xf32>
    %8 = arith.subf %4, %7 : vector<64x64xf32>
    %9 = math.exp %8 : vector<64x64xf32>
    %cst_6 = arith.constant dense<0.000000e+00> : vector<64xf32>
    %10 = vector.multi_reduction <add>, %9, %cst_6 [1] : vector<64x64xf32> to vector<64xf32>
    %11 = vector.shape_cast %10 : vector<64xf32> to vector<64x1xf32>
    %12 = tpu.reciprocal %11 {approx = true} : vector<64x1xf32> -> vector<64x1xf32>
    %13 = vector.broadcast %12 : vector<64x1xf32> to vector<64x64xf32>
    %14 = arith.mulf %9, %13 : vector<64x64xf32>
    %c0_7 = arith.constant 0 : index
    %c0_8 = arith.constant 0 : index
    %c0_9 = arith.constant 0 : index
    %15 = vector.load %arg8[%c0_7, %c0_8, %c0_9] : memref<1x64x64xf32, #tpu.memory_space<vmem>>, vector<1x64x64xf32>
    %16 = vector.shape_cast %15 : vector<1x64x64xf32> to vector<64x64xf32>
    %17 = vector.shape_cast %14 : vector<64x64xf32> to vector<1x64x64xf32>
    tpu.vector_store %arg8[%c0_7, %c0_8, %c0_9], %17 {strides = array<i32>} : memref<1x64x64xf32, #tpu.memory_space<vmem>>, vector<1x64x64xf32>,
    %c0_10 = arith.constant 0 : index
    %c0_11 = arith.constant 0 : index
    %c0_12 = arith.constant 0 : index
    %18 = vector.load %arg5[%c0_10, %c0_11, %c0_12] : memref<1x16x64xbf16, #tpu.memory_space<vmem>>, vector<1x16x64xbf16>
    %19 = vector.shape_cast %18 : vector<1x16x64xbf16> to vector<16x64xbf16>
    %20 = arith.truncf %14 : vector<64x64xf32> to vector<64x64xbf16>
    %cst_13 = arith.constant dense<0.000000e+00> : vector<16x64xf32>
    %21 = tpu.matmul %19, %20, %cst_13 {dimension_numbers = #tpu.dot_dimension_numbers<[1], [1], [0], [0], [0, 0, 1, 0], [], []>} : vector<16x64xbf16>, vector<64x64xbf16>, vector<16x64xf32> -> vector<16x64xf32>
    %c0_14 = arith.constant 0 : index
    %c0_15 = arith.constant 0 : index
    %c0_16 = arith.constant 0 : index
    %22 = vector.load %arg2[%c0_14, %c0_15, %c0_16] : memref<1x16x64xf32, #tpu.memory_space<vmem>>, vector<1x16x64xf32>
    %23 = vector.shape_cast %22 : vector<1x16x64xf32> to vector<16x64xf32>
    %c0_17 = arith.constant 0 : index
    %24 = memref.load %arg6[%c0_17] : memref<1xf32, #tpu.memory_space<smem>>
    %25 = vector.broadcast %24 : f32 to vector<16x64xf32>
    %26 = arith.mulf %25, %21 : vector<16x64xf32>
    %27 = arith.addf %23, %26 : vector<16x64xf32>
    %c0_18 = arith.constant 0 : index
    %c0_19 = arith.constant 0 : index
    %c0_20 = arith.constant 0 : index
    %28 = vector.load %arg7[%c0_18, %c0_19, %c0_20] : memref<1x16x64xf32, #tpu.memory_space<vmem>>, vector<1x16x64xf32>
    %29 = vector.shape_cast %28 : vector<1x16x64xf32> to vector<16x64xf32>
    %30 = vector.shape_cast %27 : vector<16x64xf32> to vector<1x16x64xf32>
    tpu.vector_store %arg7[%c0_18, %c0_19, %c0_20], %30 {strides = array<i32>} : memref<1x16x64xf32, #tpu.memory_space<vmem>>, vector<1x16x64xf32>,
    return
  }
  func.func @transform_0(%arg0: i32, %arg1: i32) -> (i32, i32, i32) {
    %c0_i32 = arith.constant 0 : i32
    %c0_i32_0 = arith.constant 0 : i32
    return %arg0, %c0_i32, %arg1 : i32, i32, i32
  }
  func.func @transform_1(%arg0: i32, %arg1: i32) -> (i32, i32, i32) {
    %c0_i32 = arith.constant 0 : i32
    %c0_i32_0 = arith.constant 0 : i32
    %c0_i32_1 = arith.constant 0 : i32
    return %arg0, %c0_i32, %c0_i32_0 : i32, i32, i32
  }
  func.func @transform_2(%arg0: i32, %arg1: i32) -> (i32, i32, i32) {
    %c0_i32 = arith.constant 0 : i32
    %c0_i32_0 = arith.constant 0 : i32
    return %arg0, %arg1, %c0_i32 : i32, i32, i32
  }
  func.func @transform_3(%arg0: i32, %arg1: i32) -> (i32, i32, i32) {
    %c0_i32 = arith.constant 0 : i32
    %c0_i32_0 = arith.constant 0 : i32
    %c0_i32_1 = arith.constant 0 : i32
    return %arg0, %c0_i32, %c0_i32_0 : i32, i32, i32
  }
  func.func @transform_4(%arg0: i32, %arg1: i32) -> i32 {
    %c0_i32 = arith.constant 0 : i32
    %c0_i32_0 = arith.constant 0 : i32
    return %c0_i32 : i32
  }
  func.func @transform_5(%arg0: i32, %arg1: i32) -> (i32, i32, i32) {
    %c0_i32 = arith.constant 0 : i32
    %c0_i32_0 = arith.constant 0 : i32
    return %arg0, %c0_i32, %arg1 : i32, i32, i32
  }
  func.func @transform_6(%arg0: i32, %arg1: i32) -> (i32, i32, i32) {
    %c0_i32 = arith.constant 0 : i32
    %c0_i32_0 = arith.constant 0 : i32
    return %arg0, %arg1, %c0_i32 : i32, i32, i32
  }
}

</mosaic_0001>

<bundles_post_ra>
// kernel: tpu_custom_call.1
= control target key start
LH: loop header
LB: loop body
LE: loop exit
PB: predicated region body
PF: predicated region fallthrough
CT: control target
= control target key end

     0   :  { %s1379_s0 = inlined_call_operand.vmem [shape: f32[2,16,64], index: 0, kind: input, shape index: {}]   ;;  %s1380_s1 = inlined_call_operand.vmem [shape: bf16[2,2,64], index: 1, kind: input, shape index: {}]   ;;  %s1381_s2 = inlined_call_operand.vmem [shape: bf16[2,64,2], index: 2, kind: input, shape index: {}]   ;;  %s1382_s3 = inlined_call_operand.vmem [shape: bf16[2,16,64], index: 3, kind: input, shape index: {}]   ;;  %s1383_s4 = inlined_call_operand.<no memory space> [shape: f32[1], index: 4, kind: input, shape index: {}]   ;;  %s1384_s5 = inlined_call_operand.hbm [shape: f32[2,16,64], index: 5, kind: output, shape index: {0}]   ;;  %s1385_s6 = inlined_call_operand.hbm [shape: f32[2,64,64], index: 6, kind: output, shape index: {1}]  }
   0x1   :  { %1386 = sst [smem:[#allocation9_spill]] %s1380_s1 }
   0x2   :  { %12 = sst [smem:[#allocation2]] %s1383_s4 }
   0x3   :  { %13 = vsyncpa [#allocation4], 0 }
   0x4   :  { %15 = vsyncpa [#allocation4 + $0x1], 0 }
   0x5   :  { %16 = vsyncpa [#allocation6], 0 }
   0x6   :  { %18 = vsyncpa [#allocation6 + $0x1], 0  ;;  %s1162_s23 = smov 0   ;;  %s1164_s24 = smov 0  }
   0x7   :  { %s1166_s25 = smov 0   ;;  %s1168_s26 = smov 0  }
   0x8   :  { %s1170_s27 = smov 0   ;;  %s1172_s28 = smov 0  }
   0x9 LB: > { %s836_s4 = sadd.s32 4294967295, %s1116_s28   ;;  %s837_s29 = sadd.s32 4294967294, %s1116_s28   ;;  %s1116_s28 = sphi %s1172_s28, %s24_s28   ;;  %s1112_s27 = sphi %s1170_s27, %s1394_s27   ;;  %s1108_s26 = sphi %s1168_s26, %s1393_s26   ;;  %s1104_s25 = sphi %s1166_s25, %s1392_s25   ;;  %s1100_s24 = sphi %s1164_s24, %s1391_s24   ;;  %s1096_s23 = sphi %s1162_s23, %s1390_s23  }
   0xa   : > { %s36_s30 = sadd.s32 1, %s1112_s27  ;;  %s174_s7 = sadd.s32 1, %s1104_s25 }
   0xb   : > { %p38_p0 = scmp.ge.s32.totalorder %s36_s30, 2  ;;  %p184_p1 = scmp.ne.s32.totalorder %s1104_s25, %s1100_s24 }
   0xc   : > { %p185_p2 = scmp.eq.s32.totalorder %s836_s4, 1  ;;  %p190_p3 = scmp.ne.s32.totalorder %s1100_s24, %s1096_s23 }
   0xd   : > { %s1396_s30 = smov (%p38_p0, %s36_s30), 0  ;;  %p191_p5 = scmp.eq.s32.totalorder %s837_s29, 1 }
   0xe   : > { %p1202_p4 = por %p185_p2, %p184_p1  ;;  %s169_s9 = ssub.s32 %s1112_s27, %s1396_s30 }
   0xf   : > { %p840_p6 = scmp.ge.s32.totalorder %s1116_s28, 1  ;;  %p172_p7 = scmp.eq.s32.totalorder %s169_s9, 0 }
  0x10   : > { %p1209_p8 = por %p191_p5, %p190_p3  ;;  %p278_p9 = scmp.lt.s32.totalorder %s1116_s28, 3 }
  0x11   : > { %s1215_s11 = scalar_select %p172_p7, %s1104_s25, %s174_s7  }
  0x12   : > { %p279_p10 = pnand %p840_p6, %p278_p9 }
  0x13   : > { %p333_p11 = scmp.lt.s32.totalorder (!%p279_p10), %s1108_s26, 1  ;;  %vm403_vm0 = vcmask (!%p279_p10), 1040384   ;;  %s1389_s1 = sld [smem:[#allocation9_spill]] (!%p279_p10)  ;;  %vm390_vm1 = vcmask (!%p279_p10), 15360   ;;  %vm472_vm2 = vcmask (!%p279_p10), 523264   ;;  %v1118_v62 = vmov (!%p279_p10), 0.0  }
  0x14   : > { %282 = sbr.rel (%p279_p10) target bundleno = 833 (0x341), region = 40  ;;  %892 = vmatprep.subr.bf16.mxu1 (!%p279_p10), %v1118_v62  ;;  %vm1119_vm3 = vmmov (!%p279_p10), 0   ;;  %s1252_s29 = sand.u32 (!%p279_p10), 1, %s1100_s24  }
  0x15   : > { %900 = vmatprep.mubr.msk.bf16.mxu1 (!%p279_p10), %vm1119_vm3, %v1118_v62  ;;  %s842_s7 = sshll.u32 (!%p279_p10), %s1252_s29, 6  ;;  %s871_s13 = sshll.u32 (!%p279_p10), %s1108_s26, 10 }
  0x16   : > { %s1255_s9 = scalar_lea.vmem (!%p279_p10), [#allocation5], %s842_s7  ;;  %s652_s18 = scalar_lea.sflag (!%p279_p10), [#allocation6], %s1252_s29 }
  0x17   : > { %s684_s17 = sshll.u32 (!%p279_p10), %s1255_s9, 4  ;;  %s1286_s17 = int_to_ptr.vmem [resolvable:$true] %s684_s17 }
  0x1b   : > { %s1219_s12 = scalar_select %p333_p11, %s1108_s26, 1 }
  0x1d   : > { %s343_s15 = scalar_lea.vmem %s1389_s1, %s1219_s12  ;;  %s868_s16 = sshll.u32 %s1219_s12, 5 }
  0x1e   : > { %s352_s19 = scalar_lea.vmem %s1381_s2, %s868_s16  ;;  %v369_v0 = vld [vmem:[%s343_s15] sm:$0x1]  ;;  %s869_s20 = sshll.u32 %s1219_s12, 3 }
  0x1f   : > { %904 = vmatprep.subr.msk.bf16.mxu0 %vm403_vm0, %v369_v0  ;;  %v405_v1 = vsel %vm403_vm0, %v369_v0, 0  ;;  %v969_v2 = vld [vmem:[%s352_s19] sm:$0xff]   ;;  %v970_v3 = vld [vmem:[%s352_s19 + $0x8] sm:$0xff]   ;;  %v971_v4 = vld [vmem:[%s352_s19 + $0x10] sm:$0xff]   ;;  %s1249_s4 = scalar_lea.vmem %s1382_s3, %s869_s20  ;;  %s1283_s16 = scalar_lea.hbm %s1385_s6, %s871_s13 }
  0x20   : > { %883 = vmatpush3.bf16.msra.mxu0 %v405_v1  ;;  %884 = vmatprep.mubr.msk.bf16.mxu0 %vm390_vm1, %v969_v2  ;;  %v972_v5 = vld [vmem:[%s352_s19 + $0x18] sm:$0xff]   ;;  %s1006_s19 = scalar_lea.vmem %s1286_s17, 1024  ;;  %s1120_s20 = smov [#allocation5]  }
  0x21   : > { %p1007_p12 = scmp.ne.s32.totalorder %s1286_s17, %s1006_s19  ;;  %s1010_s21 = sshll.u32 %s1120_s20, 4  ;;  %s1011_s21 = int_to_ptr.vmem [resolvable:$false] %s1010_s21 }
  0x22   : > { %s1012_s22 = scalar_lea.vmem %s1011_s21, 2048  ;;  %p1013_p1 = scmp.lt.s32.totalorder %s1286_s17, %s1011_s21 }
  0x23   : > { %885 = vmatmul.mubr.msk.bf16.vlgmr.msra.gmra.mrb[0].mxu0 %vm390_vm1, %v970_v3  ;;  %p1008_p13 = pnand %p1007_p12, %p1202_p4  ;;  %p1014_p2 = scmp.lt.s32.totalorder %s1012_s22, %s1006_s19 }
  0x24   : > { %888 = vmatprep.mubr.msk.bf16.mxu0 %vm390_vm1, %v971_v4 }
  0x25   : > { %p1009_p0 = pneg %p1008_p13  ;;  %p1015_p3 = por %p1014_p2, %p1013_p1 }
  0x27   : > { %p1016_p5 = pnand %p1015_p3, %p1009_p0 }
  0x2b   : > { %889 = vmatmul.mubr.msk.bf16.gmra.mrb[4].mxu0 %vm390_vm1, %v972_v5 }
  0xf6   : > { %v886_v6 = vpop.f32.mrb[0].mxu0 }
  0xf7   : > { %v441_v7 = vpop.f32.mrb[1].mxu0  ;;  %v479_v8 = vsel %vm472_vm2, %v886_v6, -inf }
  0xf8   : > { %480 = vmax.xlane.f32.xlu1 %v479_v8  ;;  %v887_v9 = vpop.f32.mrb[2].mxu0  ;;  %v473_v10 = vsel %vm472_vm2, %v441_v7, -inf }
  0xf9   : > { %474 = vmax.xlane.f32.xlu0 %v473_v10  ;;  %v444_v11 = vpop.f32.mrb[3].mxu0  ;;  %v482_v12 = vsel %vm472_vm2, %v887_v9, -inf }
  0xfa   : > { %v476_v13 = vsel %vm472_vm2, %v444_v11, -inf }
  0xfc   : > { %483 = vmax.xlane.f32.xlu1 %v482_v12 }
  0xfd   : > { %477 = vmax.xlane.f32.xlu0 %v476_v13 }
  0xfe   : > { %v890_v14 = vpop.f32.mrb[4].mxu0 }
  0xff   : > { %v457_v15 = vpop.f32.mrb[5].mxu0  ;;  %v491_v20 = vsel %vm472_vm2, %v890_v14, -inf }
 0x100   : > { %v891_v16 = vpop.f32.mrb[6].mxu0  ;;  %v485_v17 = vsel %vm472_vm2, %v457_v15, -inf }
 0x101   : > { %486 = vmax.xlane.f32.xlu0 %v485_v17  ;;  %v460_v18 = vpop.f32.mrb[7].mxu0  ;;  %v494_v21 = vsel %vm472_vm2, %v891_v16, -inf }
 0x102   : > { %v488_v19 = vsel %vm472_vm2, %v460_v18, -inf }
 0x103   : > { %489 = vmax.xlane.f32.xlu1 %v488_v19 }
 0x105   : > { %492 = vmax.xlane.f32.xlu0 %v491_v20 }
 0x107   : > { %495 = vmax.xlane.f32.xlu1 %v494_v21 }
 0x185   : > { %v481_v22 = vpop.xlane.xlu1 %480 }
 0x186   : > { %v499_v23 = vsub.f32 %v886_v6, %v481_v22  ;;  %v475_v24 = vpop.xlane.xlu0 %474 }
 0x187   : > { %v497_v25 = vsub.f32 %v441_v7, %v475_v24 }
 0x188   : > { %v509_v26 = vmul.f32 1.442695, %v499_v23 }
 0x189   : > { %v505_v27 = vmul.f32 1.442695, %v497_v25  ;;  %v484_v28 = vpop.xlane.xlu1 %483 }
 0x18a   : > { %v500_v29 = vsub.f32 %v887_v9, %v484_v28  ;;  %v478_v30 = vpop.xlane.xlu0 %477 }
 0x18b   : > { %974 = vpow2.f32 %v505_v27  ;;  %v498_v31 = vsub.f32 %v444_v11, %v478_v30 }
 0x18c   : > { %976 = vpow2.f32 %v509_v26  ;;  %v511_v32 = vmul.f32 1.442695, %v500_v29 }
 0x18d   : > { %v507_v33 = vmul.f32 1.442695, %v498_v31  ;;  %v973_v31 = vld [vmem:[%s1249_s4] sm:$0xff]  }
 0x18e   : > { %v487_v34 = vpop.xlane.xlu0 %486 }
 0x18f   : > { %978 = vpow2.f32 %v507_v33  ;;  %v501_v35 = vsub.f32 %v457_v15, %v487_v34 }
 0x190   : > { %v490_v36 = vpop.xlane.xlu1 %489  ;;  %980 = vpow2.f32 %v511_v32 }
 0x191   : > { %v513_v37 = vmul.f32 1.442695, %v501_v35  ;;  %v502_v38 = vsub.f32 %v460_v18, %v490_v36 }
 0x192   : > { %v493_v39 = vpop.xlane.xlu0 %492 }
 0x193   : > { %982 = vpow2.f32 %v513_v37  ;;  %v515_v40 = vmul.f32 1.442695, %v502_v38  ;;  %v503_v41 = vsub.f32 %v890_v14, %v493_v39 }
 0x194   : > { %v496_v42 = vpop.xlane.xlu1 %495 }
 0x195   : > { %v975_v43 = vpop.eup %974  ;;  %984 = vpow2.f32 %v515_v40  ;;  %v517_v44 = vmul.f32 1.442695, %v503_v41  ;;  %v504_v45 = vsub.f32 %v891_v16, %v496_v42 }
 0x196   : > { %v521_v46 = vsel %vm472_vm2, %v975_v43, 0.0  ;;  %v977_v47 = vpop.eup %976 }
 0x197   : > { %986 = vpow2.f32 %v517_v44  ;;  %v519_v48 = vmul.f32 1.442695, %v504_v45  ;;  %522 = vadd.xlane.f32.xlu0 %v521_v46  ;;  %v527_v50 = vsel %vm472_vm2, %v977_v47, 0.0 }
 0x199   : > { %v979_v49 = vpop.eup %978  ;;  %988 = vpow2.f32 %v519_v48 }
 0x19a   : > { %v524_v51 = vsel %vm472_vm2, %v979_v49, 0.0  ;;  %v981_v52 = vpop.eup %980 }
 0x19b   : > { %528 = vadd.xlane.f32.xlu0 %v527_v50  ;;  %525 = vadd.xlane.f32.xlu1 %v524_v51  ;;  %v530_v55 = vsel %vm472_vm2, %v981_v52, 0.0 }
 0x19d   : > { %v983_v53 = vpop.eup %982 }
 0x19e   : > { %v533_v54 = vsel %vm472_vm2, %v983_v53, 0.0 }
 0x19f   : > { %v985_v56 = vpop.eup %984  ;;  %534 = vadd.xlane.f32.xlu0 %v533_v54  ;;  %531 = vadd.xlane.f32.xlu1 %v530_v55 }
 0x1a0   : > { %v536_v59 = vsel %vm472_vm2, %v985_v56, 0.0 }
 0x1a1   : > { %v987_v57 = vpop.eup %986 }
 0x1a2   : > { %v539_v58 = vsel %vm472_vm2, %v987_v57, 0.0 }
 0x1a3   : > { %v989_v60 = vpop.eup %988  ;;  %540 = vadd.xlane.f32.xlu0 %v539_v58  ;;  %537 = vadd.xlane.f32.xlu1 %v536_v59 }
 0x1a4   : > { %v542_v61 = vsel %vm472_vm2, %v989_v60, 0.0 }
 0x1a7   : > { %543 = vadd.xlane.f32.xlu1 %v542_v61 }
 0x224   : > { %v523_v63 = vpop.xlane.xlu0 %522 }
 0x225   : > { %990 = vrcp.f32 %v523_v63 }
 0x228   : > { %v529_v0 = vpop.xlane.xlu0 %528  ;;  %v526_v1 = vpop.xlane.xlu1 %525 }
 0x229   : > { %992 = vrcp.f32 %v529_v0 }
 0x22a   : > { %994 = vrcp.f32 %v526_v1 }
 0x22c   : > { %v535_v2 = vpop.xlane.xlu0 %534  ;;  %v532_v3 = vpop.xlane.xlu1 %531 }
 0x22d   : > { %996 = vrcp.f32 %v535_v2 }
 0x22e   : > { %998 = vrcp.f32 %v532_v3 }
 0x22f   : > { %v991_v4 = vpop.eup %990 }
 0x230   : > { %v541_v5 = vpop.xlane.xlu0 %540  ;;  %v538_v6 = vpop.xlane.xlu1 %537  ;;  %v553_v7 = vmul.f32 %v991_v4, %v975_v43 }
 0x231   : > { %1000 = vrcp.f32 %v541_v5 }
 0x232   : > { %1002 = vrcp.f32 %v538_v6  ;;  %561 = vst.msk [vmem:[%s1255_s9] sm:$0xff] %vm472_vm2, %v553_v7 }
 0x233   : > { %v993_v8 = vpop.eup %992 }
 0x234   : > { %v995_v9 = vpop.eup %994  ;;  %v544_v10 = vpop.xlane.xlu1 %543  ;;  %v555_v11 = vmul.f32 %v993_v8, %v977_v47 }
 0x235   : > { %1004 = vrcp.f32 %v544_v10  ;;  %v554_v12 = vmul.f32 %v995_v9, %v979_v49 }
 0x236   : > { %563 = vst.msk [vmem:[%s1255_s9 + $0x10] sm:$0xff] %vm472_vm2, %v555_v11 }
 0x237   : > { %v997_v13 = vpop.eup %996  ;;  %562 = vst.msk [vmem:[%s1255_s9 + $0x8] sm:$0xff] %vm472_vm2, %v554_v12  ;;  %v571_v14 = vpack.c.bf16 %v554_v12, %v553_v7 }
 0x238   : > { %v999_v15 = vpop.eup %998  ;;  %v557_v16 = vmul.f32 %v997_v13, %v983_v53 }
 0x239   : > { %v584_v17 = vsel %vm472_vm2, %v571_v14, 0  ;;  %v556_v18 = vmul.f32 %v999_v15, %v981_v52 }
 0x23a   : > { %893 = vmatpush3.bf16.xpose.msra.mxu1 %v584_v17  ;;  %565 = vst.msk [vmem:[%s1255_s9 + $0x20] sm:$0xff] %vm472_vm2, %v557_v16 }
 0x23b   : > { %v1001_v19 = vpop.eup %1000  ;;  %894 = vmatprep.subr.bf16.mxu1 %v1118_v62  ;;  %564 = vst.msk [vmem:[%s1255_s9 + $0x18] sm:$0xff] %vm472_vm2, %v556_v18  ;;  %v572_v22 = vpack.c.bf16 %v556_v18, %v555_v11 }
 0x23c   : > { %v1003_v20 = vpop.eup %1002  ;;  %v559_v21 = vmul.f32 %v1001_v19, %v987_v57 }
 0x23d   : > { %v558_v23 = vmul.f32 %v1003_v20, %v985_v56  ;;  %v587_v26 = vsel %vm472_vm2, %v572_v22, 0 }
 0x23e   : > { %567 = vst.msk [vmem:[%s1255_s9 + $0x30] sm:$0xff] %vm472_vm2, %v559_v21 }
 0x23f   : > { %v1005_v24 = vpop.eup %1004  ;;  %566 = vst.msk [vmem:[%s1255_s9 + $0x28] sm:$0xff] %vm472_vm2, %v558_v23  ;;  %v573_v27 = vpack.c.bf16 %v558_v23, %v557_v16 }
 0x240   : > { %v560_v25 = vmul.f32 %v1005_v24, %v989_v60 }
 0x241   : > { %v590_v28 = vsel %vm472_vm2, %v573_v27, 0 }
 0x242   : > { %895 = vmatpush3.bf16.xpose.msra.mxu1 %v587_v26  ;;  %568 = vst.msk [vmem:[%s1255_s9 + $0x38] sm:$0xff] %vm472_vm2, %v560_v25  ;;  %v574_v29 = vpack.c.bf16 %v560_v25, %v559_v21 }
 0x243   : > { %896 = vmatprep.subr.bf16.mxu1 %v1118_v62 }
 0x244   : > { %v593_v30 = vsel %vm472_vm2, %v574_v29, 0 }
 0x24a   : > { %897 = vmatpush3.bf16.xpose.msra.mxu1 %v590_v28 }
 0x24b   : > { %898 = vmatprep.subr.bf16.mxu1 %v1118_v62 }
 0x252   : > { %899 = vmatpush3.bf16.xpose.msra.mxu1 %v593_v30 }
 0x259   : > { %901 = vmatmul.mubr.msk.bf16.vlgmr.msra.gmra.mrb[0].mxu1 %vm472_vm2, %v973_v31 }
 0x25a   : > { %1019 = shalt.err (!%p1016_p5)
}
 0x25b   : > { %s1020_s4 = scalar_lea.hbm %s1283_s16, 1024  ;;  %s1024_s13 = scalar_lea.hbm %s1385_s6, 2048 }
 0x25c   : > { %p1021_p6 = scmp.ne.s32.totalorder %s1283_s16, %s1020_s4  ;;  %p1025_p10 = scmp.lt.u32.totalorder %s1283_s16, %s1385_s6 }
 0x25d   : > { %p1026_p11 = scmp.lt.u32.totalorder %s1024_s13, %s1020_s4  ;;  %p1028_p13 = scmp.lt.u32.totalorder %s1020_s4, %s1283_s16 }
 0x25e   : > { %p1022_p7 = pnand %p1021_p6, %p1202_p4 }
 0x25f   : > { %p1027_p12 = por %p1026_p11, %p1025_p10 }
 0x260   : > { %p1023_p9 = pneg %p1022_p7 }
 0x261   : > { %p1029_p0 = por %p1028_p13, %p1027_p12 }
 0x263   : > { %p1030_p1 = pnand %p1029_p0, %p1023_p9 }
 0x265   : > { %1033 = shalt.err (!%p1030_p1)
}
 0x266   : > { %s1121_s19 = smov 128   ;;  %s1122_s20 = smov 8  }
 0x267   : > { %906 = dma.vmem_to_hbm [thread:$0]  (%p1202_p4), %s1286_s17, 1024, %s1283_s16, %s652_s18, %s1121_s19, %s1121_s19, %s1122_s20  }
 0x268   : > { %s638_s21 = sld [smem:[#allocation2]]  ;;  %s867_s22 = sshll.u32 %s1219_s12, 4 }
 0x269   : > { %s841_s4 = sshll.u32 %s1252_s29, 4  ;;  %s340_s13 = scalar_lea.vmem %s1379_s0, %s867_s22 }
 0x26a   : > { %v636_v34 = vld [vmem:[%s340_s13] sm:$0xff]  ;;  %s325_s14 = scalar_lea.vmem [#allocation3], %s841_s4  ;;  %v637_v38 = vld [vmem:[%s340_s13 + $0x8] sm:$0xff]  ;;  %s870_s1 = sshll.u32 %s1108_s26, 8 }
 0x26b   : > { %s666_s15 = sshll.u32 %s325_s14, 4  ;;  %s1325_s17 = scalar_lea.hbm %s1384_s5, %s870_s1  ;;  %s1327_s15 = int_to_ptr.vmem [resolvable:$true] %s666_s15 }
 0x26c   : > { %s647_s18 = scalar_lea.sflag [#allocation4], %s1252_s29  ;;  %s1034_s26 = scalar_lea.vmem %s1327_s15, 256 }
 0x26d   : > { %p1035_p2 = scmp.ne.s32.totalorder %s1327_s15, %s1034_s26 }
 0x26e   : > { %v639_v32 = vstv %s638_s21  ;;  %s1123_s21 = smov [#allocation3]  }
 0x26f   : > { %p1036_p3 = pnand %p1035_p2, %p1202_p4  ;;  %s1038_s22 = sshll.u32 %s1123_s21, 4  ;;  %s1039_s22 = int_to_ptr.vmem [resolvable:$false] %s1038_s22 }
 0x270   : > { %s1040_s4 = scalar_lea.vmem %s1039_s22, 512  ;;  %p1041_p6 = scmp.lt.s32.totalorder %s1327_s15, %s1039_s22 }
 0x271   : > { %p1037_p5 = pneg %p1036_p3  ;;  %p1042_p7 = scmp.lt.s32.totalorder %s1040_s4, %s1034_s26 }
 0x273   : > { %p1043_p9 = por %p1042_p7, %p1041_p6 }
 0x275   : > { %p1044_p10 = pnand %p1043_p9, %p1037_p5 }
 0x32c   : > { %v629_v33 = vpop.f32.mrb[0].mxu1 }
 0x32d   : > { %v640_v35 = vmul.f32 %v639_v32, %v629_v33  ;;  %v902_v36 = vpop.f32.mrb[1].mxu1 }
 0x32e   : > { %v632_v37 = vpop.f32.mrb[2].mxu1 }
 0x32f   : > { %v642_v39 = vadd.f32 %v640_v35, %v636_v34  ;;  %v641_v40 = vmul.f32 %v639_v32, %v632_v37  ;;  %v903_v41 = vpop.f32.mrb[3].mxu1 }
 0x331   : > { %644 = vst.msk [vmem:[%s325_s14] sm:$0xff] %vm472_vm2, %v642_v39  ;;  %v643_v42 = vadd.f32 %v641_v40, %v637_v38 }
 0x333   : > { %645 = vst.msk [vmem:[%s325_s14 + $0x8] sm:$0xff] %vm472_vm2, %v643_v42 }
 0x334   : > { %1047 = shalt.err (!%p1044_p10)
}
 0x335   : > { %s1048_s1 = scalar_lea.hbm %s1325_s17, 256  ;;  %s1052_s13 = scalar_lea.hbm %s1384_s5, 512 }
 0x336   : > { %p1049_p11 = scmp.ne.s32.totalorder %s1325_s17, %s1048_s1  ;;  %p1053_p0 = scmp.lt.u32.totalorder %s1325_s17, %s1384_s5 }
 0x337   : > { %p1054_p1 = scmp.lt.u32.totalorder %s1052_s13, %s1048_s1  ;;  %p1056_p3 = scmp.lt.u32.totalorder %s1048_s1, %s1325_s17 }
 0x338   : > { %p1050_p12 = pnand %p1049_p11, %p1202_p4 }
 0x339   : > { %p1055_p2 = por %p1054_p1, %p1053_p0 }
 0x33a   : > { %p1051_p13 = pneg %p1050_p12 }
 0x33b   : > { %p1057_p5 = por %p1056_p3, %p1055_p2 }
 0x33d   : > { %p1058_p6 = pnand %p1057_p5, %p1051_p13 }
 0x33f   : > { %1061 = shalt.err (!%p1058_p6)
}
 0x340   : > { %905 = dma.vmem_to_hbm [thread:$0]  (%p1202_p4), %s1327_s15, 256, %s1325_s17, %s647_s18, %s1121_s19, %s1121_s19, %s1122_s20  }
 0x341 PF: > { %p916_p7 = scmp.ge.s32.totalorder %s1116_s28, 2  ;;  %s699_s16 = sand.u32 1, %s1096_s23  }
 0x342   : > { %s700_s26 = scalar_lea.sflag [#allocation4], %s699_s16 }
 0x343   : > { %p910_p9 = pnand %p916_p7, %p1209_p8 }
 0x345   : > { %1087 = dma.done.wait (!%p910_p9), %s700_s26, 256  }
 0x346   : > { %1089 = vsyncadd (!%p910_p9), %s700_s26, 4294967040  ;;  %s709_s8 = scalar_lea.sflag [#allocation6], %s699_s16 }
 0x347   : > { %1091 = dma.done.wait (!%p910_p9), %s709_s8, 1024  }
 0x348   : > { %1093 = vsyncadd (!%p910_p9), %s709_s8, 4294966272  ;;  %s24_s28 = sadd.s32 1, %s1116_s28   ;;  %s1390_s23 = smov %s1100_s24 }
 0x349   : > { %p21_p10 = scmp.ge.s32.totalorder %s24_s28, 4   ;;  %s1391_s24 = smov %s1104_s25 }
 0x34a   : > { %s1392_s25 = smov %s1215_s11  ;;  %s1393_s26 = smov %s1112_s27 }
 0x34b   : > { %s1394_s27 = smov %s1396_s30  ;;  %23 = sbr.rel (!%p21_p10) target bundleno = 9 (0x9), region = 101 }
 0x352   :  { %714 = vsyncpa [#allocation4], 1 }
 0x353   :  { %716 = vsyncpa [#allocation4 + $0x1], 1 }
 0x354   :  { %717 = vsyncpa [#allocation6], 1 }
 0x355   :  { %719 = vsyncpa [#allocation6 + $0x1], 1 }

</bundles_post_ra>
